<compile_context>
chip_gen: v6e
topology: v6e:2x2x1
jax: 0.10.0
libtpu: 0.0.40
codegen_flags: <defaults>
</compile_context>

<pallas_src>
import jax
import jax.numpy as jnp
from jax.experimental import pallas as pl
from jax.experimental.pallas import tpu as pltpu

_LANE = 128


def _swish_kernel(x_ref, o_ref):
    xf = x_ref[...].astype(jnp.float32)
    # swish(x) = x * sigmoid(x) = 0.5 * x * (1 + tanh(x/2))   (exact identity)
    out = 0.5 * xf * (1.0 + jnp.tanh(0.5 * xf))
    o_ref[...] = out.astype(o_ref.dtype)


def swish(x, *, target_block_bytes=2 * 1024 * 1024):
    """Elementwise Swish: x * sigmoid(x). Accepts any shape (e.g. NCHW)."""
    orig_shape = x.shape
    dtype = x.dtype
    n = x.size
    if n == 0:
        return x

    itemsize = jnp.dtype(dtype).itemsize
    pack = max(8, 32 // itemsize)  # sublane granularity: 8 f32 / 16 bf16 / 32 int8

    # Lane-dense 2D view; pad the flat length only when strictly necessary.
    x_flat = x.reshape(-1)
    lane_pad = (-n) % _LANE
    if lane_pad:
        x_flat = jnp.pad(x_flat, (0, lane_pad))
    rows = x_flat.size // _LANE
    x2d = x_flat.reshape(rows, _LANE)

    # Block sizing: ~target_block_bytes per block. With default double-buffering
    # (2 input + 2 output buffers) total VMEM ~= 4x block, well within the
    # default scoped limit on v5e/v6e/v7x. Small inputs use one full-extent block.
    tr_target = max(pack, target_block_bytes // (_LANE * itemsize))
    if rows <= tr_target:
        tr = rows                          # full-extent block (always legal)
    else:
        tr = max(pack, (tr_target // pack) * pack)
    grid = (pl.cdiv(rows, tr),)            # ragged last block is masked by Pallas

    out2d = pl.pallas_call(
        _swish_kernel,
        out_shape=jax.ShapeDtypeStruct((rows, _LANE), dtype),
        grid_spec=pltpu.PrefetchScalarGridSpec(
            num_scalar_prefetch=0,
            grid=grid,
            in_specs=[pl.BlockSpec((tr, _LANE), lambda i: (i, 0))],
            out_specs=pl.BlockSpec((tr, _LANE), lambda i: (i, 0)),
        ),
        compiler_params=pltpu.CompilerParams(
            dimension_semantics=("parallel",),
        ),
        cost_estimate=pl.CostEstimate(
            flops=5 * n,
            transcendentals=n,
            bytes_accessed=2 * n * itemsize,
        ),
    )(x2d)

    out_flat = out2d.reshape(-1)
    if lane_pad:
        out_flat = out_flat[:n]
    return out_flat.reshape(orig_shape)


def _check(x, **kw):
    y = swish(x, **kw)
    jax.block_until_ready(y)
    y_ref = x * jax.nn.sigmoid(x)
    assert y.shape == x.shape and y.dtype == x.dtype
    assert jnp.allclose(y, y_ref, atol=1e-5, rtol=1e-5), "mismatch vs reference"
    return y


if __name__ == "__main__":
    key = jax.random.PRNGKey(0)
    k0, k1, k2 = jax.random.split(key, 3)

    # Primary NCHW input, consistent with Swish usage inside EfficientNet blocks.
    x = jax.random.normal(k0, (2, 4, 16, 16), dtype=jnp.float32)
    _check(x)

    # Lane-pad path: numel not a multiple of 128.
    x_odd = jax.random.normal(k1, (2, 3, 5, 7), dtype=jnp.float32)
    _check(x_odd)

    # Multi-block + ragged-last-block path (tiny block size to force a >1 grid).
    x_big = jax.random.normal(k2, (2, 8, 24, 24), dtype=jnp.float32)
    _check(x_big, target_block_bytes=8 * 1024)

    print("KERNEL_OK")
</pallas_src>

<mosaic_0001>
module attributes {stable_mosaic.version = 11 : i64} {
  func.func @_swish_kernel(%arg0: i32, %arg1: memref<16x128xf32, #tpu.memory_space<vmem>>, %arg2: memref<16x128xf32, #tpu.memory_space<vmem>>) attributes {dimension_semantics = [#tpu.dimension_semantics<parallel>], iteration_bounds = array<i64: 1>, scalar_prefetch = 0 : i64, scratch_operands = 0 : i64, tpu.core_type = #tpu.core_type<tc>, window_params = [{transform_indices = @transform_0, window_bounds = array<i64: 16, 128>}, {transform_indices = @transform_1, window_bounds = array<i64: 16, 128>}]} {
    %c0 = arith.constant 0 : index
    %c0_0 = arith.constant 0 : index
    %0 = vector.load %arg1[%c0, %c0_0] : memref<16x128xf32, #tpu.memory_space<vmem>>, vector<16x128xf32>
    %cst = arith.constant 5.000000e-01 : f32
    %1 = vector.broadcast %cst : f32 to vector<16x128xf32>
    %2 = arith.mulf %1, %0 : vector<16x128xf32>
    %cst_1 = arith.constant 5.000000e-01 : f32
    %3 = vector.broadcast %cst_1 : f32 to vector<16x128xf32>
    %4 = arith.mulf %3, %0 : vector<16x128xf32>
    %5 = math.tanh %4 : vector<16x128xf32>
    %cst_2 = arith.constant 1.000000e+00 : f32
    %6 = vector.broadcast %cst_2 : f32 to vector<16x128xf32>
    %7 = arith.addf %6, %5 : vector<16x128xf32>
    %8 = arith.mulf %2, %7 : vector<16x128xf32>
    %c0_3 = arith.constant 0 : index
    %c0_4 = arith.constant 0 : index
    %9 = vector.load %arg2[%c0_3, %c0_4] : memref<16x128xf32, #tpu.memory_space<vmem>>, vector<16x128xf32>
    tpu.vector_store %arg2[%c0_3, %c0_4], %8 {strides = array<i32>} : memref<16x128xf32, #tpu.memory_space<vmem>>, vector<16x128xf32>,
    return
  }
  func.func @transform_0(%arg0: i32) -> (i32, i32) {
    %c0_i32 = arith.constant 0 : i32
    %c0_i32_0 = arith.constant 0 : i32
    return %arg0, %c0_i32 : i32, i32
  }
  func.func @transform_1(%arg0: i32) -> (i32, i32) {
    %c0_i32 = arith.constant 0 : i32
    %c0_i32_0 = arith.constant 0 : i32
    return %arg0, %c0_i32 : i32, i32
  }
}

</mosaic_0001>

<bundles_post_ra>
// kernel: tpu_custom_call.1
= control target key start
LH: loop header
LB: loop body
LE: loop exit
PB: predicated region body
PF: predicated region fallthrough
CT: control target
= control target key end

     0   :  { %6 = vsyncpa [#allocation3], 0  ;;  %s130_s0 = inlined_call_operand.hbm [shape: f32[16,128], index: 0, kind: input, shape index: {}]   ;;  %s131_s1 = inlined_call_operand.hbm [shape: f32[16,128], index: 1, kind: output, shape index: {}]  }
   0x1   :  { %7 = vsyncpa [#allocation4], 0  ;;  %s104_s6 = smov [#allocation2]  }
   0x2   :  { %s13_s7 = sshll.u32 %s104_s6, 4  ;;  %s14_s7 = int_to_ptr.vmem [resolvable:$true] %s13_s7 }
   0x3   :  { %s68_s8 = scalar_lea.vmem %s14_s7, 256  ;;  %p73_p1 = scmp.lt.s32.totalorder %s14_s7, %s14_s7 }
   0x4   :  { %p69_p0 = scmp.ne.s32.totalorder %s14_s7, %s68_s8  ;;  %p74_p2 = scmp.lt.s32.totalorder %s68_s8, %s68_s8 }
   0x6   :  { %p75_p3 = por %p74_p2, %p73_p1 }
   0x8   :  { %p76_p4 = pnand %p75_p3, %p69_p0 }
   0xa   :  { %79 = shalt.err (!%p76_p4)
}
   0xb   :  { %s105_s9 = smov 128   ;;  %s106_s10 = smov 8  }
   0xc   :  { %19 = dma.hbm_to_vmem [thread:$0]  %s130_s0, 256, %s14_s7, [#allocation3], %s105_s9, %s105_s9, %s106_s10  }
   0xd   :  { %100 = dma.done.wait [#allocation3], 256  }
   0xe   :  { %101 = vsyncadd [#allocation3], 4294967040  ;;  %v23_v0 = vld [vmem:[#allocation2] sm:$0xff]  ;;  %v24_v1 = vld [vmem:[#allocation2 + $0x8] sm:$0xff]  ;;  %s107_s13 = smov [#allocation5]  }
   0xf   :  { %v25_v2 = vmul.f32 0.5, %v23_v0  ;;  %v26_v3 = vmul.f32 0.5, %v24_v1  ;;  %s40_s14 = sshll.u32 %s107_s13, 4  ;;  %s41_s14 = int_to_ptr.vmem [resolvable:$true] %s40_s14 }
  0x10   :  { %s80_s0 = scalar_lea.vmem %s41_s14, 256  ;;  %p85_p6 = scmp.lt.s32.totalorder %s41_s14, %s41_s14 }
  0x11   :  { %56 = vtanh.f32 %v25_v2  ;;  %p81_p5 = scmp.ne.s32.totalorder %s41_s14, %s80_s0  ;;  %p86_p7 = scmp.lt.s32.totalorder %s80_s0, %s80_s0 }
  0x12   :  { %58 = vtanh.f32 %v26_v3 }
  0x13   :  { %p87_p8 = por %p86_p7, %p85_p6 }
  0x15   :  { %p88_p9 = pnand %p87_p8, %p81_p5 }
  0x1e   :  { %v57_v4 = vpop.eup %56 }
  0x1f   :  { %v59_v5 = vpop.eup %58  ;;  %v29_v6 = vadd.f32 1.0, %v57_v4 }
  0x20   :  { %v30_v7 = vadd.f32 1.0, %v59_v5 }
  0x21   :  { %v31_v8 = vmul.f32 %v29_v6, %v25_v2 }
  0x22   :  { %v32_v9 = vmul.f32 %v30_v7, %v26_v3 }
  0x23   :  { %33 = vst [vmem:[#allocation5] sm:$0xff] %v31_v8 }
  0x24   :  { %34 = vst [vmem:[#allocation5 + $0x8] sm:$0xff] %v32_v9 }
  0x25   :  { %91 = shalt.err (!%p88_p9)
}
  0x26   :  { %46 = dma.vmem_to_hbm [thread:$0]  %s41_s14, 256, %s131_s1, [#allocation4], %s105_s9, %s105_s9, %s106_s10  }
  0x27   :  { %102 = dma.done.wait [#allocation4], 256  }
  0x28   :  { %103 = vsyncadd [#allocation4], 4294967040 }
  0x29   :  { %50 = vsyncpa [#allocation3], 1 }
  0x2a   :  { %51 = vsyncpa [#allocation4], 1 }

</bundles_post_ra>
